<compile_context>
chip_gen: v7x
topology: tpu7x:2x2x1
jax: 0.10.0
libtpu: 0.0.40
codegen_flags: <defaults>
</compile_context>

<pallas_src>
import jax
import jax.numpy as jnp
from jax.experimental import pallas as pl
from jax.experimental.pallas import tpu as pltpu

_MAX_LANES = 1024                        # preferred lane-dense last dim (multiple of 128)
_TARGET_BLOCK_BYTES = 4 * 1024 * 1024    # ~4 MiB per block, independent of dtype
_FAST_PATH_BYTES = 1 << 20               # below ~1 MiB plain jnp ReLU is strictly faster


def _relu_kernel(x_ref, o_ref):
    # Entire hot path: one VPU max per vreg on fully lane-dense tiles.
    o_ref[...] = jnp.maximum(x_ref[...], jnp.zeros((), dtype=x_ref.dtype))


def _round_up(a, b):
    return ((a + b - 1) // b) * b


def _pick_lanes(total):
    """Largest multiple of 128 (<= _MAX_LANES) dividing `total` exactly, else None."""
    for k in range(_MAX_LANES // 128, 0, -1):
        lanes = 128 * k
        if total % lanes == 0:
            return lanes
    return None


def nla_forward(x, *, force_pallas=False, in_place=False):
    """ReLU forward pass matching NLA.forward (same shape / dtype / values).

    force_pallas: bypass the tiny-input fast path (used by the self-test).
    in_place:     alias output onto the input HBM buffer; only a win when the
                  caller donates `x` inside jit (otherwise XLA inserts a copy).
    """
    orig_shape = x.shape
    total = x.size
    dtype = x.dtype
    itemsize = jnp.dtype(dtype).itemsize

    # --- tiny-input fast path: pallas_call fixed cost dominates below ~1 MiB ---
    if total * itemsize <= _FAST_PATH_BYTES and not force_pallas:
        return jnp.maximum(x, jnp.zeros((), dtype=dtype))

    # --- lane-dense 2-D view of the flat data: pure reshape, no pad, no slice ---
    lanes = _pick_lanes(total)
    if lanes is None:
        # No multiple-of-128 factor: a Pallas slab would need pad + slice round
        # trips (2-3x HBM traffic for a bandwidth-bound op); plain XLA ReLU wins.
        return jnp.maximum(x, jnp.zeros((), dtype=dtype))

    rows = total // lanes

    # Sublane packing alignment per dtype (f32 -> 8, bf16 -> 16, int8 -> 32).
    row_align = max(8, 32 // max(1, itemsize))

    # ~4 MiB blocks regardless of dtype, capped at ~half the rows so the grid
    # has >= 2 steps and both v7x TensorCores get work. Ragged last block is
    # handled by Pallas (masked writes), so no row padding is needed either.
    max_tile_rows = max(row_align,
                        (_TARGET_BLOCK_BYTES // (lanes * itemsize)) // row_align * row_align)
    half_rows = _round_up(pl.cdiv(rows, 2), row_align)
    tile_rows = max(row_align, min(max_tile_rows, half_rows))

    x2d = x.reshape(rows, lanes)            # contiguous reshape: free (bitcast)
    grid = (pl.cdiv(rows, tile_rows),)

    out2d = pl.pallas_call(
        _relu_kernel,
        out_shape=jax.ShapeDtypeStruct((rows, lanes), dtype),
        grid=grid,
        in_specs=[pl.BlockSpec((tile_rows, lanes), lambda i: (i, 0))],
        out_specs=pl.BlockSpec((tile_rows, lanes), lambda i: (i, 0)),
        # Footprint win when x is donated by the caller's jit; opt-in to avoid
        # a defensive copy when x stays live.
        input_output_aliases=({0: 0} if in_place else {}),
        compiler_params=pltpu.CompilerParams(
            # "parallel" lets the runtime shard the streaming axis across the
            # two TensorCores on v7x; neutral on single-core v5e/v6e.
            # (If a v7x profile shows one TC idle, switch to pltpu.CORE_PARALLEL.)
            dimension_semantics=("parallel",),
            # <= 16 MiB of double-buffered blocks; 32 MiB raises v5e's 16 MiB
            # default and stays well inside v7x's 64 MiB per-core VMEM.
            vmem_limit_bytes=32 * 1024 * 1024,
        ),
    )(x2d)

    return out2d.reshape(orig_shape)


if __name__ == "__main__":
    key = jax.random.PRNGKey(0)
    k1, k2 = jax.random.split(key)

    # Small NCHW input consistent with the module's forward (takes the fast path).
    x_small = jax.random.normal(k1, (2, 4, 16, 16), dtype=jnp.float32)
    out_small = nla_forward(x_small)
    # Same small input forced through the Pallas kernel (exercises the kernel).
    out_small_pallas = nla_forward(x_small, force_pallas=True)
    # Medium input: default path runs the Pallas kernel with a multi-step grid.
    x_big = jax.random.normal(k2, (8, 32, 64, 64), dtype=jnp.float32)
    out_big = nla_forward(x_big)

    jax.block_until_ready((out_small, out_small_pallas, out_big))

    ref_small = jnp.maximum(x_small, 0.0)
    ref_big = jnp.maximum(x_big, 0.0)
    assert out_small.shape == x_small.shape and out_small.dtype == x_small.dtype
    assert bool(jnp.array_equal(out_small, ref_small))
    assert out_small_pallas.shape == x_small.shape and out_small_pallas.dtype == x_small.dtype
    assert bool(jnp.array_equal(out_small_pallas, ref_small))
    assert out_big.shape == x_big.shape and out_big.dtype == x_big.dtype
    assert bool(jnp.array_equal(out_big, ref_big))

    print("KERNEL_OK")
</pallas_src>

<mosaic_0001>
module attributes {stable_mosaic.version = 11 : i64} {
  func.func @_relu_kernel(%arg0: i32, %arg1: memref<8x1024xf32, #tpu.memory_space<vmem>>, %arg2: memref<8x1024xf32, #tpu.memory_space<vmem>>) attributes {dimension_semantics = [#tpu.dimension_semantics<parallel>], iteration_bounds = array<i64: 1>, scalar_prefetch = 0 : i64, scratch_operands = 0 : i64, tpu.core_type = #tpu.core_type<tc>, window_params = [{transform_indices = @transform_0, window_bounds = array<i64: 8, 1024>}, {transform_indices = @transform_1, window_bounds = array<i64: 8, 1024>}]} {
    %c0 = arith.constant 0 : index
    %c0_0 = arith.constant 0 : index
    %0 = vector.load %arg1[%c0, %c0_0] : memref<8x1024xf32, #tpu.memory_space<vmem>>, vector<8x1024xf32>
    %cst = arith.constant 0.000000e+00 : f32
    %1 = vector.broadcast %cst : f32 to vector<8x1024xf32>
    %2 = arith.maximumf %0, %1 : vector<8x1024xf32>
    %c0_1 = arith.constant 0 : index
    %c0_2 = arith.constant 0 : index
    %3 = vector.load %arg2[%c0_1, %c0_2] : memref<8x1024xf32, #tpu.memory_space<vmem>>, vector<8x1024xf32>
    tpu.vector_store %arg2[%c0_1, %c0_2], %2 {strides = array<i32>} : memref<8x1024xf32, #tpu.memory_space<vmem>>, vector<8x1024xf32>,
    return
  }
  func.func @transform_0(%arg0: i32) -> (i32, i32) {
    %c0_i32 = arith.constant 0 : i32
    %c0_i32_0 = arith.constant 0 : i32
    return %arg0, %c0_i32 : i32, i32
  }
  func.func @transform_1(%arg0: i32) -> (i32, i32) {
    %c0_i32 = arith.constant 0 : i32
    %c0_i32_0 = arith.constant 0 : i32
    return %arg0, %c0_i32 : i32, i32
  }
}

</mosaic_0001>

<bundles_post_ra>
// kernel: tpu_custom_call.1
= control target key start
LH: loop header
LB: loop body
LE: loop exit
PB: predicated region body
PF: predicated region fallthrough
CT: control target
= control target key end

     0   :  { %6 = vsyncpa [#allocation3], 0  ;;  %s160_s0 = inlined_call_operand.hbm [shape: f32[2,1024], index: 0, kind: input, shape index: {}]   ;;  %s161_s1 = inlined_call_operand.hbm [shape: f32[2,1024], index: 1, kind: output, shape index: {}]  }
   0x1   :  { %7 = vsyncpa [#allocation4], 0 }
   0x2   :  { %12 = vsyncadd [#allocation3], 768  ;;  %s116_s6 = smov [#allocation2]   ;;  %s68_s10 = scalar_lea.hbm %s160_s0, 256 }
   0x3   :  { %s13_s7 = sshll.u32 %s116_s6, 4  ;;  %p69_p0 = scmp.ne.s32.totalorder %s160_s0, %s68_s10  ;;  %s14_s7 = int_to_ptr.vmem [resolvable:$true] %s13_s7 }
   0x4   :  { %p72_p1 = scmp.lt.u32.totalorder %s68_s10, %s160_s0 }
   0x6   :  { %p74_p2 = pnand %p72_p1, %p69_p0 }
   0x8   :  { %77 = shalt.err (!%p74_p2)
}
   0x9   :  { %s78_s15 = scalar_lea.vmem %s14_s7, 256  ;;  %s82_s16 = scalar_lea.vmem %s14_s7, 1024 }
   0xa   :  { %p79_p3 = scmp.ne.s32.totalorder %s14_s7, %s78_s15  ;;  %p83_p4 = scmp.lt.s32.totalorder %s14_s7, %s14_s7 }
   0xb   :  { %p84_p5 = scmp.lt.s32.totalorder %s82_s16, %s78_s15 }
   0xd   :  { %p85_p6 = por %p84_p5, %p83_p4 }
   0xf   :  { %p86_p7 = pnand %p85_p6, %p79_p3 }
  0x11   :  { %89 = shalt.err (!%p86_p7)
}
  0x12   :  { %s117_s17 = smov 256   ;;  %s118_s18 = smov 16  }
  0x13   :  { %19 = dma.hbm_to_vmem [thread:$0]  %s160_s0, 256, %s14_s7, [#allocation3], %s117_s17, %s117_s17, %s118_s18  }
  0x14   :  { %112 = dma.done.wait [#allocation3], 1024  }
  0x15   :  { %113 = vsyncadd [#allocation3], 4294966272  ;;  %v23_v0 = vld [vmem:[#allocation2] sm:$0xff]  ;;  %v24_v1 = vld [vmem:[#allocation2 + $0x8] sm:$0xff] }
  0x16   :  { %v25_v2 = vld [vmem:[#allocation2 + $0x10] sm:$0xff]  ;;  %v31_v3 = vmax.f32 %v23_v0, 0.0  ;;  %v32_v4 = vmax.f32 %v24_v1, 0.0  ;;  %v26_v6 = vld [vmem:[#allocation2 + $0x18] sm:$0xff]  ;;  %v27_v7 = vld [vmem:[#allocation2 + $0x20] sm:$0xff] }
  0x17   :  { %v33_v5 = vmax.f32 %v25_v2, 0.0  ;;  %v28_v8 = vld [vmem:[#allocation2 + $0x28] sm:$0xff]  ;;  %v34_v9 = vmax.f32 %v26_v6, 0.0  ;;  %v35_v10 = vmax.f32 %v27_v7, 0.0  ;;  %v29_v12 = vld [vmem:[#allocation2 + $0x30] sm:$0xff]  ;;  %v30_v13 = vld [vmem:[#allocation2 + $0x38] sm:$0xff] }
  0x18   :  { %v36_v11 = vmax.f32 %v28_v8, 0.0  ;;  %39 = vst [vmem:[#allocation5] sm:$0xff] %v31_v3  ;;  %40 = vst [vmem:[#allocation5 + $0x8] sm:$0xff] %v32_v4  ;;  %v37_v14 = vmax.f32 %v29_v12, 0.0  ;;  %v38_v15 = vmax.f32 %v30_v13, 0.0 }
  0x19   :  { %41 = vst [vmem:[#allocation5 + $0x10] sm:$0xff] %v33_v5  ;;  %42 = vst [vmem:[#allocation5 + $0x18] sm:$0xff] %v34_v9 }
  0x1a   :  { %43 = vst [vmem:[#allocation5 + $0x20] sm:$0xff] %v35_v10  ;;  %44 = vst [vmem:[#allocation5 + $0x28] sm:$0xff] %v36_v11 }
  0x1b   :  { %45 = vst [vmem:[#allocation5 + $0x30] sm:$0xff] %v37_v14  ;;  %46 = vst [vmem:[#allocation5 + $0x38] sm:$0xff] %v38_v15 }
  0x1c   :  { %51 = vsyncadd [#allocation4], 768  ;;  %s119_s0 = smov [#allocation5]  }
  0x1d   :  { %s52_s21 = sshll.u32 %s119_s0, 4  ;;  %s53_s21 = int_to_ptr.vmem [resolvable:$true] %s52_s21 }
  0x1e   :  { %s90_s22 = scalar_lea.vmem %s53_s21, 256  ;;  %s94_s23 = scalar_lea.vmem %s53_s21, 1024 }
  0x1f   :  { %p91_p8 = scmp.ne.s32.totalorder %s53_s21, %s90_s22  ;;  %p95_p9 = scmp.lt.s32.totalorder %s53_s21, %s53_s21 }
  0x20   :  { %p96_p10 = scmp.lt.s32.totalorder %s94_s23, %s90_s22 }
  0x22   :  { %p97_p11 = por %p96_p10, %p95_p9 }
  0x24   :  { %p98_p12 = pnand %p97_p11, %p91_p8 }
  0x26   :  { %101 = shalt.err (!%p98_p12)
}
  0x27   :  { %s102_s26 = scalar_lea.hbm %s161_s1, 256 }
  0x28   :  { %p103_p13 = scmp.ne.s32.totalorder %s161_s1, %s102_s26  ;;  %p106_p0 = scmp.lt.u32.totalorder %s102_s26, %s161_s1 }
  0x2a   :  { %p108_p1 = pnand %p106_p0, %p103_p13 }
  0x2c   :  { %111 = shalt.err (!%p108_p1)
}
  0x2d   :  { %58 = dma.vmem_to_hbm [thread:$0]  %s53_s21, 256, %s161_s1, [#allocation4], %s117_s17, %s117_s17, %s118_s18  }
  0x2e   :  { %114 = dma.done.wait [#allocation4], 1024  }
  0x2f   :  { %115 = vsyncadd [#allocation4], 4294966272 }
  0x30   :  { %62 = vsyncpa [#allocation3], 1 }
  0x31   :  { %63 = vsyncpa [#allocation4], 1 }

</bundles_post_ra>
